<compile_context>
chip_gen: v7x
topology: tpu7x:2x2x1
jax: 0.10.0
libtpu: 0.0.40
codegen_flags: <defaults>
</compile_context>

<pallas_src>
import jax
import jax.numpy as jnp
from jax.experimental import pallas as pl
from jax.experimental.pallas import tpu as pltpu

IN_FEATURES = 10
OUT_FEATURES = 1

# Max batch-tile size (sublanes of the x block). VMEM per buffer (f32, minor
# dim lane-padded to 128): x tile = 512*TILE_B bytes, out tile = 512*TILE_B
# bytes; double-buffered total ~= 2048*TILE_B bytes -> ~4 MiB at TILE_B=2048.
_TILE_B_MAX = 2048


def _round_up(n, m):
    return ((n + m - 1) // m) * m


def _linear_kernel(x_ref, w_ref, b_ref, o_ref):
    # x_ref: (TILE_B, 10) VMEM  -- native (batch, feature) layout (no transpose)
    # w_ref: (1, 10)      VMEM  -- weight row, sublane-broadcast against x
    # b_ref: (1, 1)       SMEM  -- scalar bias
    # o_ref: (TILE_B, 1)  VMEM
    # Upcast before the reduce so bf16 inputs would still accumulate in f32.
    prod = x_ref[...].astype(jnp.float32) * w_ref[...].astype(jnp.float32)  # VPU
    acc = jnp.sum(prod, axis=-1, keepdims=True)                             # XLU lane reduce -> (TILE_B, 1)
    o_ref[...] = (acc + b_ref[0, 0]).astype(o_ref.dtype)


def linear_pallas(x, w_row, b_scalar, *, tile_b_max=_TILE_B_MAX):
    """y = x @ w_row.T + b with x (B, 10), w_row (1, 10), b_scalar (1, 1) -> (B, 1)."""
    batch, in_features = x.shape
    assert in_features == IN_FEATURES
    assert w_row.shape == (OUT_FEATURES, IN_FEATURES)
    assert b_scalar.shape == (1, 1)

    # Batch tile: multiple of 8 sublanes, capped so the double-buffered VMEM
    # footprint stays ~4 MiB (fits default scoped VMEM on v5e/v6e/v7x).
    tile_b = min(tile_b_max, _round_up(batch, 8))
    batch_pad = _round_up(batch, tile_b)
    if batch_pad != batch:
        # Pad the ragged last tile so every grid step sees a full block and no
        # out-of-range rows are written; padding is sliced off below.
        x = jnp.pad(x, ((0, batch_pad - batch), (0, 0)))

    grid = (batch_pad // tile_b,)

    y = pl.pallas_call(
        _linear_kernel,
        out_shape=jax.ShapeDtypeStruct((batch_pad, OUT_FEATURES), x.dtype),
        grid=grid,
        in_specs=[
            # x: tiled along batch -> auto double-buffered DMA overlaps compute.
            pl.BlockSpec((tile_b, IN_FEATURES), lambda i: (i, 0)),
            # w: same tiny block every step -> stays resident in VMEM.
            pl.BlockSpec((1, IN_FEATURES), lambda i: (0, 0)),
            # bias: whole (1, 1) scalar in SMEM.
            pl.BlockSpec(memory_space=pltpu.MemorySpace.SMEM),
        ],
        out_specs=pl.BlockSpec((tile_b, OUT_FEATURES), lambda i: (i, 0)),
        compiler_params=pltpu.CompilerParams(
            # Batch tiles are independent: lets v7x shard the grid across both
            # TensorCores; harmless no-op on single-TC v5e/v6e.
            dimension_semantics=("parallel",),
        ),
        cost_estimate=pl.CostEstimate(
            flops=2 * IN_FEATURES * batch_pad,
            transcendentals=0,
            bytes_accessed=(IN_FEATURES + OUT_FEATURES) * 4 * batch_pad
            + 4 * (IN_FEATURES * OUT_FEATURES + OUT_FEATURES),
        ),
    )(x, w_row, b_scalar)

    if batch_pad != batch:
        y = y[:batch]
    return y


@jax.jit
def _forward(x, w_row, b_scalar):
    # jit so the (cheap) pad/slice plumbing fuses into surrounding XLA.
    return linear_pallas(x, w_row, b_scalar)


class DummyModelPallas:
    """JAX/Pallas equivalent of the PyTorch DummyModel: one Linear(10, 1)."""

    def __init__(self, key):
        in_features, out_features = IN_FEATURES, OUT_FEATURES
        k_w, k_b = jax.random.split(key)
        # PyTorch nn.Linear default init: U(-1/sqrt(in), 1/sqrt(in)).
        bound = 1.0 / jnp.sqrt(jnp.float32(in_features))
        # Keep the PyTorch (out, in) weight layout directly: (1, 10) row.
        self.w_row = jax.random.uniform(
            k_w, (out_features, in_features), jnp.float32, -bound, bound
        )
        b = jax.random.uniform(k_b, (out_features,), jnp.float32, -bound, bound)
        self.b = b.reshape(1, out_features)  # (1, 1) scalar for SMEM

    def __call__(self, x):
        return _forward(x, self.w_row, self.b)


if __name__ == "__main__":
    key = jax.random.PRNGKey(0)
    k_model, k_x1, k_x2 = jax.random.split(key, 3)

    model = DummyModelPallas(k_model)

    def reference(x):
        return x @ model.w_row.T + model.b

    # Small-shape test consistent with the module (batch=8, features=10).
    x_small = jax.random.normal(k_x1, (8, IN_FEATURES), dtype=jnp.float32)
    y_small = model(x_small)
    jax.block_until_ready(y_small)
    assert y_small.shape == (8, OUT_FEATURES)
    assert jnp.allclose(y_small, reference(x_small), atol=1e-5, rtol=1e-5)

    # Additional check exercising multi-tile grid + ragged-batch padding.
    x_big = jax.random.normal(k_x2, (2500, IN_FEATURES), dtype=jnp.float32)
    y_big = model(x_big)
    jax.block_until_ready(y_big)
    assert y_big.shape == (2500, OUT_FEATURES)
    assert jnp.allclose(y_big, reference(x_big), atol=1e-5, rtol=1e-5)

    print("KERNEL_OK")
</pallas_src>

<mosaic_0001>
module attributes {stable_mosaic.version = 11 : i64} {
  func.func @_linear_kernel(%arg0: i32, %arg1: memref<8x10xf32, #tpu.memory_space<vmem>>, %arg2: memref<1x10xf32, #tpu.memory_space<vmem>>, %arg3: memref<1x1xf32, #tpu.memory_space<smem>>, %arg4: memref<8x1xf32, #tpu.memory_space<vmem>>) attributes {dimension_semantics = [#tpu.dimension_semantics<parallel>], iteration_bounds = array<i64: 1>, scalar_prefetch = 0 : i64, scratch_operands = 0 : i64, tpu.core_type = #tpu.core_type<tc>, window_params = [{transform_indices = @transform_0, window_bounds = array<i64: 8, 10>}, {pipeline_mode = #tpu.pipeline_mode<synchronous>, transform_indices = @transform_1, window_bounds = array<i64: 1, 10>}, {transform_indices = @transform_2, window_bounds = array<i64: 1, 1>}, {transform_indices = @transform_3, window_bounds = array<i64: 8, 1>}]} {
    %c0 = arith.constant 0 : index
    %c0_0 = arith.constant 0 : index
    %0 = vector.load %arg1[%c0, %c0_0] : memref<8x10xf32, #tpu.memory_space<vmem>>, vector<8x10xf32>
    %c0_1 = arith.constant 0 : index
    %c0_2 = arith.constant 0 : index
    %1 = vector.load %arg2[%c0_1, %c0_2] : memref<1x10xf32, #tpu.memory_space<vmem>>, vector<1x10xf32>
    %2 = vector.broadcast %1 : vector<1x10xf32> to vector<8x10xf32>
    %3 = arith.mulf %0, %2 : vector<8x10xf32>
    %cst = arith.constant dense<0.000000e+00> : vector<8xf32>
    %4 = vector.multi_reduction <add>, %3, %cst [1] : vector<8x10xf32> to vector<8xf32>
    %5 = vector.shape_cast %4 : vector<8xf32> to vector<8x1xf32>
    %c0_3 = arith.constant 0 : index
    %c0_4 = arith.constant 0 : index
    %6 = memref.load %arg3[%c0_3, %c0_4] : memref<1x1xf32, #tpu.memory_space<smem>>
    %7 = vector.broadcast %6 : f32 to vector<8x1xf32>
    %8 = arith.addf %5, %7 : vector<8x1xf32>
    %c0_5 = arith.constant 0 : index
    %c0_6 = arith.constant 0 : index
    %9 = vector.load %arg4[%c0_5, %c0_6] : memref<8x1xf32, #tpu.memory_space<vmem>>, vector<8x1xf32>
    tpu.vector_store %arg4[%c0_5, %c0_6], %8 {strides = array<i32>} : memref<8x1xf32, #tpu.memory_space<vmem>>, vector<8x1xf32>,
    return
  }
  func.func @transform_0(%arg0: i32) -> (i32, i32) {
    %c0_i32 = arith.constant 0 : i32
    %c0_i32_0 = arith.constant 0 : i32
    return %arg0, %c0_i32 : i32, i32
  }
  func.func @transform_1(%arg0: i32) -> (i32, i32) {
    %c0_i32 = arith.constant 0 : i32
    %c0_i32_0 = arith.constant 0 : i32
    %c0_i32_1 = arith.constant 0 : i32
    return %c0_i32, %c0_i32_0 : i32, i32
  }
  func.func @transform_2(%arg0: i32) -> (i32, i32) {
    %c0_i32 = arith.constant 0 : i32
    %c0_i32_0 = arith.constant 0 : i32
    %c0_i32_1 = arith.constant 0 : i32
    return %c0_i32, %c0_i32_0 : i32, i32
  }
  func.func @transform_3(%arg0: i32) -> (i32, i32) {
    %c0_i32 = arith.constant 0 : i32
    %c0_i32_0 = arith.constant 0 : i32
    return %arg0, %c0_i32 : i32, i32
  }
}

</mosaic_0001>

<bundles_post_ra>
// kernel: _forward.1
= control target key start
LH: loop header
LB: loop body
LE: loop exit
PB: predicated region body
PF: predicated region fallthrough
CT: control target
= control target key end

     0   :  { %9 = vsyncpa [#allocation4], 0  ;;  %s76_s12 = smov [#allocation3]   ;;  %s118_s0 = inlined_call_operand.hbm [shape: f32[8,10], index: 0, kind: input, shape index: {}]   ;;  %s119_s1 = inlined_call_operand.vmem [shape: f32[1,10], index: 1, kind: input, shape index: {}]   ;;  %s120_s2 = inlined_call_operand.<no memory space> [shape: f32[1,1], index: 2, kind: input, shape index: {}]   ;;  %s121_s3 = inlined_call_operand.vmem [shape: f32[8,1], index: 3, kind: output, shape index: {}]  }
   0x1   :  { %s16_s13 = sshll.u32 %s76_s12, 4  ;;  %s52_s16 = scalar_lea.hbm %s118_s0, 128  ;;  %s17_s13 = int_to_ptr.vmem [resolvable:$true] %s16_s13 }
   0x2   :  { %p53_p0 = scmp.ne.s32.totalorder %s118_s0, %s52_s16  ;;  %p56_p1 = scmp.lt.u32.totalorder %s52_s16, %s118_s0 }
   0x4   :  { %p58_p2 = pnand %p56_p1, %p53_p0 }
   0x6   :  { %61 = shalt.err (!%p58_p2)
}
   0x7   :  { %s62_s21 = scalar_lea.vmem %s17_s13, 128  ;;  %p67_p4 = scmp.lt.s32.totalorder %s17_s13, %s17_s13 }
   0x8   :  { %p63_p3 = scmp.ne.s32.totalorder %s17_s13, %s62_s21  ;;  %p68_p5 = scmp.lt.s32.totalorder %s62_s21, %s62_s21 }
   0xa   :  { %p69_p6 = por %p68_p5, %p67_p4 }
   0xc   :  { %p70_p7 = pnand %p69_p6, %p63_p3 }
   0xe   :  { %73 = shalt.err (!%p70_p7)
}
   0xf   :  { %19 = dma.hbm_to_vmem [thread:$0]  %s118_s0, 128, %s17_s13, [#allocation4]  }
  0x10   :  { %74 = dma.done.wait [#allocation4], 128  }
  0x11   :  { %75 = vsyncadd [#allocation4], 4294967168  ;;  %v27_v0 = vld [vmem:[#allocation3] sm:$0xff]  ;;  %vm36_vm0 = vcmask 80896   ;;  %v41_v4 = vstv %s120_s2  ;;  %vm43_vm1 = vcmask 7168  }
  0x12   :  { %v50_v1 = vld [vmem:[%s119_s1] ss:$0 sm:$0xff] }
  0x13   :  { %v35_v2 = vmul.f32 %v50_v1, %v27_v0 }
  0x15   :  { %v37_v3 = vsel %vm36_vm0, %v35_v2, 0.0 }
  0x16   :  { %38 = vadd.xlane.f32.xlu0 %v37_v3 }
  0xa3   :  { %v39_v5 = vpop.xlane.xlu0 %38 }
  0xa4   :  { %v42_v6 = vadd.f32 %v41_v4, %v39_v5 }
  0xa6   :  { %44 = vst.msk [vmem:[%s121_s3] sm:$0xff] %vm43_vm1, %v42_v6 }
  0xa7   :  { %49 = vsyncpa [#allocation4], 1 }

</bundles_post_ra>
